<compile_context>
chip_gen: v7x
topology: tpu7x:2x2x1
jax: 0.10.0
libtpu: 0.0.40
codegen_flags: <defaults>
</compile_context>

<pallas_src>
import jax
import jax.numpy as jnp
from jax.experimental import pallas as pl
from jax.experimental.pallas import tpu as pltpu


def _round_up(x, m):
    return ((x + m - 1) // m) * m


def _recommender_kernel(u_ref, it_ref, d_ref,
                        wd_ref, bd_ref,
                        w1u_ref, w1i_ref, w1d_ref, b1_ref,
                        w2_ref, b2_ref,
                        wo_ref, bo_ref,
                        out_ref):
    # description_dense + ReLU (300 -> E).  f32 block read, bf16 cast on the
    # VPU (free slack), f32 MXU accumulation.
    d = d_ref[...].astype(jnp.bfloat16)                              # (TB, 300)
    desc_h = jnp.dot(d, wd_ref[...],
                     preferred_element_type=jnp.float32) + bd_ref[...]
    desc_h = jnp.maximum(desc_h, 0.0)                                # (TB, E) f32

    # fc1 + ReLU (3E -> 64): torch.cat replaced by three accumulating dots
    # against statically-sliced bf16 weight pieces (no XLU lane shuffles).
    h1 = (jnp.dot(u_ref[...], w1u_ref[...], preferred_element_type=jnp.float32)
          + jnp.dot(it_ref[...], w1i_ref[...], preferred_element_type=jnp.float32)
          + jnp.dot(desc_h.astype(jnp.bfloat16), w1d_ref[...],
                    preferred_element_type=jnp.float32)
          + b1_ref[...])
    h1 = jnp.maximum(h1, 0.0)                                        # (TB, 64)

    # fc2 + ReLU (64 -> 32)
    h2 = jnp.dot(h1.astype(jnp.bfloat16), w2_ref[...],
                 preferred_element_type=jnp.float32) + b2_ref[...]
    h2 = jnp.maximum(h2, 0.0)                                        # (TB, 32)

    # output head (32 -> 1), lane-dense: (1,32) @ (32,TB) -> (1,TB).
    out_ref[...] = (jnp.dot(wo_ref[...], h2.T,
                            preferred_element_type=jnp.float32) + bo_ref[...])


def prepare_inference_params(params):
    """One-time (outside the hot path) bf16 conversion + weight re-layout."""
    E = params["user_emb_table"].shape[1]
    w1 = params["w1"]
    return {
        "user_emb_table": params["user_emb_table"].astype(jnp.bfloat16),
        "item_emb_table": params["item_emb_table"].astype(jnp.bfloat16),
        "wd": params["wd"].astype(jnp.bfloat16),
        "bd": params["bd"],
        "w1u": w1[:E].astype(jnp.bfloat16),
        "w1i": w1[E:2 * E].astype(jnp.bfloat16),
        "w1d": w1[2 * E:].astype(jnp.bfloat16),
        "b1": params["b1"],
        "w2": params["w2"].astype(jnp.bfloat16),
        "b2": params["b2"],
        "wo_row": params["wo"].T,          # (1, 32) f32 for the lane-dense head
        "bo": params["bo"],                # (1, 1)  f32
    }


def recommender_forward(user_input, item_input, description_input, prep,
                        *, tb_max=2048):
    """Forward pass matching RecommenderModel.forward (eval mode).

    user_input:        (B, 1) int32
    item_input:        (B, 1) int32
    description_input: (B, 300) float32
    returns:           (B, 1) float32
    """
    assert tb_max % 128 == 0
    E = prep["user_emb_table"].shape[1]
    B, D = description_input.shape

    # Embedding lookup + squeeze(1) — gather glue in plain JAX (bf16 streams).
    user_emb = jnp.take(prep["user_emb_table"], user_input[:, 0], axis=0)  # (B,E) bf16
    item_emb = jnp.take(prep["item_emb_table"], item_input[:, 0], axis=0)  # (B,E) bf16

    # Batch tile.  No input padding: Pallas masks the ragged last tile.
    # Small B -> one tile (multiple of 8); large B -> tb_max (multiple of 128,
    # required for the lane-dense out block).  Double-buffered activation VMEM
    # is ~4.2 KB/row -> ~9 MiB at TB=2048: fits v5e/v6e (128 MiB) and v7x
    # (64 MiB, 2 TCs) with plenty of headroom; sweep tb_max=4096 on v5e/v6e.
    if B <= tb_max:
        TB = _round_up(max(B, 8), 8)
    else:
        TB = tb_max
    n_tiles = pl.cdiv(B, TB)
    Bp_out = n_tiles * TB        # lane-dense padded output only; inputs untouched.

    def rows(i):
        return (i, 0)

    def const(i):
        return (0, 0)

    in_specs = [
        pl.BlockSpec((TB, E), rows),              # user_emb   (bf16)
        pl.BlockSpec((TB, E), rows),              # item_emb   (bf16)
        pl.BlockSpec((TB, D), rows),              # description (f32, cast in-kernel)
        pl.BlockSpec(prep["wd"].shape, const),
        pl.BlockSpec(prep["bd"].shape, const),
        pl.BlockSpec(prep["w1u"].shape, const),
        pl.BlockSpec(prep["w1i"].shape, const),
        pl.BlockSpec(prep["w1d"].shape, const),
        pl.BlockSpec(prep["b1"].shape, const),
        pl.BlockSpec(prep["w2"].shape, const),
        pl.BlockSpec(prep["b2"].shape, const),
        pl.BlockSpec(prep["wo_row"].shape, const),
        pl.BlockSpec(prep["bo"].shape, const),
    ]

    flops = 2 * B * (D * E + 3 * E * 64 + 64 * 32 + 32)
    act_bytes = B * (D * 4 + 2 * E * 2 + 4)
    w_bytes = (D * E + 3 * E * 64 + 64 * 32) * 2 + (E + 64 + 32 + 32 + 1) * 4
    cost = pl.CostEstimate(flops=flops, transcendentals=0,
                           bytes_accessed=act_bytes + w_bytes)

    out = pl.pallas_call(
        _recommender_kernel,
        out_shape=jax.ShapeDtypeStruct((1, Bp_out), jnp.float32),
        grid=(n_tiles,),
        in_specs=in_specs,
        out_specs=pl.BlockSpec((1, TB), lambda i: (0, i)),
        compiler_params=pltpu.CompilerParams(
            dimension_semantics=("parallel",),     # splits grid on v7x's 2 TCs
            vmem_limit_bytes=48 * 1024 * 1024),
        cost_estimate=cost,
    )(user_emb, item_emb, description_input,
      prep["wd"], prep["bd"],
      prep["w1u"], prep["w1i"], prep["w1d"], prep["b1"],
      prep["w2"], prep["b2"],
      prep["wo_row"], prep["bo"])

    return out[0, :B].reshape(B, 1)


def init_params(key, n_users, n_items, embedding_dim):
    """Deterministic synthetic parameter init (PyTorch-default-like), f32."""
    ks = jax.random.split(key, 10)

    def linear(kw, kb, fan_in, fan_out):
        bound = 1.0 / jnp.sqrt(float(fan_in))
        w = jax.random.uniform(kw, (fan_in, fan_out), jnp.float32, -bound, bound)
        b = jax.random.uniform(kb, (1, fan_out), jnp.float32, -bound, bound)
        return w, b

    params = {}
    params["user_emb_table"] = jax.random.normal(ks[0], (n_users, embedding_dim), jnp.float32)
    params["item_emb_table"] = jax.random.normal(ks[1], (n_items, embedding_dim), jnp.float32)
    params["wd"], params["bd"] = linear(ks[2], ks[3], 300, embedding_dim)
    params["w1"], params["b1"] = linear(ks[4], ks[5], embedding_dim * 3, 64)
    params["w2"], params["b2"] = linear(ks[6], ks[7], 64, 32)
    params["wo"], params["bo"] = linear(ks[8], ks[9], 32, 1)
    return params


if __name__ == "__main__":
    B = 8
    n_users, n_items, embedding_dim = 16, 24, 32

    key = jax.random.PRNGKey(0)
    kp, ku, ki, kd = jax.random.split(key, 4)

    params = init_params(kp, n_users, n_items, embedding_dim)
    prep = prepare_inference_params(params)       # one-time bf16 conversion

    user_input = jax.random.randint(ku, (B, 1), 0, n_users, dtype=jnp.int32)
    item_input = jax.random.randint(ki, (B, 1), 0, n_items, dtype=jnp.int32)
    description_input = jax.random.normal(kd, (B, 300), jnp.float32)

    out = recommender_forward(user_input, item_input, description_input, prep)
    jax.block_until_ready(out)
    assert out.shape == (B, 1) and out.dtype == jnp.float32

    # Reference 1: matched numerics (bf16 MXU operands, f32 accumulation).
    f32 = jnp.float32
    ue = jnp.take(prep["user_emb_table"], user_input[:, 0], axis=0)
    ie = jnp.take(prep["item_emb_table"], item_input[:, 0], axis=0)
    dh = jnp.maximum(
        jnp.dot(description_input.astype(jnp.bfloat16), prep["wd"],
                preferred_element_type=f32) + prep["bd"], 0.0)
    h1 = jnp.maximum(
        jnp.dot(ue, prep["w1u"], preferred_element_type=f32)
        + jnp.dot(ie, prep["w1i"], preferred_element_type=f32)
        + jnp.dot(dh.astype(jnp.bfloat16), prep["w1d"], preferred_element_type=f32)
        + prep["b1"], 0.0)
    h2 = jnp.maximum(
        jnp.dot(h1.astype(jnp.bfloat16), prep["w2"], preferred_element_type=f32)
        + prep["b2"], 0.0)
    ref_matched = jnp.dot(h2, prep["wo_row"].T, preferred_element_type=f32) + prep["bo"]
    assert jnp.allclose(out, ref_matched, atol=2e-3, rtol=2e-3)

    # Reference 2: pure-f32 PyTorch semantics, looser tolerance (bf16 streams).
    ue32 = jnp.take(params["user_emb_table"], user_input[:, 0], axis=0)
    ie32 = jnp.take(params["item_emb_table"], item_input[:, 0], axis=0)
    dh32 = jnp.maximum(description_input @ params["wd"] + params["bd"], 0.0)
    cat = jnp.concatenate([ue32, ie32, dh32], axis=1)
    h1_32 = jnp.maximum(cat @ params["w1"] + params["b1"], 0.0)
    h2_32 = jnp.maximum(h1_32 @ params["w2"] + params["b2"], 0.0)
    ref_f32 = h2_32 @ params["wo"] + params["bo"]
    assert jnp.allclose(out, ref_f32, atol=5e-2, rtol=5e-2)

    print("KERNEL_OK")
</pallas_src>

<mosaic_0001>
module attributes {stable_mosaic.version = 11 : i64} {
  func.func @_recommender_kernel(%arg0: i32, %arg1: memref<8x32xbf16, #tpu.memory_space<vmem>>, %arg2: memref<8x32xbf16, #tpu.memory_space<vmem>>, %arg3: memref<8x300xf32, #tpu.memory_space<vmem>>, %arg4: memref<300x32xbf16, #tpu.memory_space<vmem>>, %arg5: memref<1x32xf32, #tpu.memory_space<vmem>>, %arg6: memref<32x64xbf16, #tpu.memory_space<vmem>>, %arg7: memref<32x64xbf16, #tpu.memory_space<vmem>>, %arg8: memref<32x64xbf16, #tpu.memory_space<vmem>>, %arg9: memref<1x64xf32, #tpu.memory_space<vmem>>, %arg10: memref<64x32xbf16, #tpu.memory_space<vmem>>, %arg11: memref<1x32xf32, #tpu.memory_space<vmem>>, %arg12: memref<1x32xf32, #tpu.memory_space<vmem>>, %arg13: memref<1x1xf32, #tpu.memory_space<vmem>>, %arg14: memref<1x8xf32, #tpu.memory_space<vmem>>) attributes {dimension_semantics = [#tpu.dimension_semantics<parallel>], iteration_bounds = array<i64: 1>, scalar_prefetch = 0 : i64, scratch_operands = 0 : i64, tpu.core_type = #tpu.core_type<tc>, window_params = [{transform_indices = @transform_0, window_bounds = array<i64: 8, 32>}, {transform_indices = @transform_1, window_bounds = array<i64: 8, 32>}, {transform_indices = @transform_2, window_bounds = array<i64: 8, 300>}, {pipeline_mode = #tpu.pipeline_mode<synchronous>, transform_indices = @transform_3, window_bounds = array<i64: 300, 32>}, {pipeline_mode = #tpu.pipeline_mode<synchronous>, transform_indices = @transform_4, window_bounds = array<i64: 1, 32>}, {pipeline_mode = #tpu.pipeline_mode<synchronous>, transform_indices = @transform_5, window_bounds = array<i64: 32, 64>}, {pipeline_mode = #tpu.pipeline_mode<synchronous>, transform_indices = @transform_6, window_bounds = array<i64: 32, 64>}, {pipeline_mode = #tpu.pipeline_mode<synchronous>, transform_indices = @transform_7, window_bounds = array<i64: 32, 64>}, {pipeline_mode = #tpu.pipeline_mode<synchronous>, transform_indices = @transform_8, window_bounds = array<i64: 1, 64>}, {pipeline_mode = #tpu.pipeline_mode<synchronous>, transform_indices = @transform_9, window_bounds = array<i64: 64, 32>}, {pipeline_mode = #tpu.pipeline_mode<synchronous>, transform_indices = @transform_10, window_bounds = array<i64: 1, 32>}, {pipeline_mode = #tpu.pipeline_mode<synchronous>, transform_indices = @transform_11, window_bounds = array<i64: 1, 32>}, {pipeline_mode = #tpu.pipeline_mode<synchronous>, transform_indices = @transform_12, window_bounds = array<i64: 1, 1>}, {transform_indices = @transform_13, window_bounds = array<i64: 1, 8>}]} {
    %c0 = arith.constant 0 : index
    %c0_0 = arith.constant 0 : index
    %0 = vector.load %arg3[%c0, %c0_0] : memref<8x300xf32, #tpu.memory_space<vmem>>, vector<8x300xf32>
    %1 = arith.truncf %0 : vector<8x300xf32> to vector<8x300xbf16>
    %c0_1 = arith.constant 0 : index
    %c0_2 = arith.constant 0 : index
    %2 = vector.load %arg4[%c0_1, %c0_2] : memref<300x32xbf16, #tpu.memory_space<vmem>>, vector<300x32xbf16>
    %cst = arith.constant dense<0.000000e+00> : vector<8x32xf32>
    %3 = tpu.matmul %1, %2, %cst {dimension_numbers = #tpu.dot_dimension_numbers<[1], [0], [0], [1], [0, 0, 1, 1], [], []>} : vector<8x300xbf16>, vector<300x32xbf16>, vector<8x32xf32> -> vector<8x32xf32>
    %c0_3 = arith.constant 0 : index
    %c0_4 = arith.constant 0 : index
    %4 = vector.load %arg5[%c0_3, %c0_4] : memref<1x32xf32, #tpu.memory_space<vmem>>, vector<1x32xf32>
    %5 = vector.broadcast %4 : vector<1x32xf32> to vector<8x32xf32>
    %6 = arith.addf %3, %5 : vector<8x32xf32>
    %cst_5 = arith.constant 0.000000e+00 : f32
    %7 = vector.broadcast %cst_5 : f32 to vector<8x32xf32>
    %8 = arith.maximumf %6, %7 : vector<8x32xf32>
    %c0_6 = arith.constant 0 : index
    %c0_7 = arith.constant 0 : index
    %9 = vector.load %arg1[%c0_6, %c0_7] : memref<8x32xbf16, #tpu.memory_space<vmem>>, vector<8x32xbf16>
    %c0_8 = arith.constant 0 : index
    %c0_9 = arith.constant 0 : index
    %10 = vector.load %arg6[%c0_8, %c0_9] : memref<32x64xbf16, #tpu.memory_space<vmem>>, vector<32x64xbf16>
    %cst_10 = arith.constant dense<0.000000e+00> : vector<8x64xf32>
    %11 = tpu.matmul %9, %10, %cst_10 {dimension_numbers = #tpu.dot_dimension_numbers<[1], [0], [0], [1], [0, 0, 1, 1], [], []>} : vector<8x32xbf16>, vector<32x64xbf16>, vector<8x64xf32> -> vector<8x64xf32>
    %c0_11 = arith.constant 0 : index
    %c0_12 = arith.constant 0 : index
    %12 = vector.load %arg2[%c0_11, %c0_12] : memref<8x32xbf16, #tpu.memory_space<vmem>>, vector<8x32xbf16>
    %c0_13 = arith.constant 0 : index
    %c0_14 = arith.constant 0 : index
    %13 = vector.load %arg7[%c0_13, %c0_14] : memref<32x64xbf16, #tpu.memory_space<vmem>>, vector<32x64xbf16>
    %cst_15 = arith.constant dense<0.000000e+00> : vector<8x64xf32>
    %14 = tpu.matmul %12, %13, %cst_15 {dimension_numbers = #tpu.dot_dimension_numbers<[1], [0], [0], [1], [0, 0, 1, 1], [], []>} : vector<8x32xbf16>, vector<32x64xbf16>, vector<8x64xf32> -> vector<8x64xf32>
    %15 = arith.addf %11, %14 : vector<8x64xf32>
    %16 = arith.truncf %8 : vector<8x32xf32> to vector<8x32xbf16>
    %c0_16 = arith.constant 0 : index
    %c0_17 = arith.constant 0 : index
    %17 = vector.load %arg8[%c0_16, %c0_17] : memref<32x64xbf16, #tpu.memory_space<vmem>>, vector<32x64xbf16>
    %cst_18 = arith.constant dense<0.000000e+00> : vector<8x64xf32>
    %18 = tpu.matmul %16, %17, %cst_18 {dimension_numbers = #tpu.dot_dimension_numbers<[1], [0], [0], [1], [0, 0, 1, 1], [], []>} : vector<8x32xbf16>, vector<32x64xbf16>, vector<8x64xf32> -> vector<8x64xf32>
    %19 = arith.addf %15, %18 : vector<8x64xf32>
    %c0_19 = arith.constant 0 : index
    %c0_20 = arith.constant 0 : index
    %20 = vector.load %arg9[%c0_19, %c0_20] : memref<1x64xf32, #tpu.memory_space<vmem>>, vector<1x64xf32>
    %21 = vector.broadcast %20 : vector<1x64xf32> to vector<8x64xf32>
    %22 = arith.addf %19, %21 : vector<8x64xf32>
    %cst_21 = arith.constant 0.000000e+00 : f32
    %23 = vector.broadcast %cst_21 : f32 to vector<8x64xf32>
    %24 = arith.maximumf %22, %23 : vector<8x64xf32>
    %25 = arith.truncf %24 : vector<8x64xf32> to vector<8x64xbf16>
    %c0_22 = arith.constant 0 : index
    %c0_23 = arith.constant 0 : index
    %26 = vector.load %arg10[%c0_22, %c0_23] : memref<64x32xbf16, #tpu.memory_space<vmem>>, vector<64x32xbf16>
    %cst_24 = arith.constant dense<0.000000e+00> : vector<8x32xf32>
    %27 = tpu.matmul %25, %26, %cst_24 {dimension_numbers = #tpu.dot_dimension_numbers<[1], [0], [0], [1], [0, 0, 1, 1], [], []>} : vector<8x64xbf16>, vector<64x32xbf16>, vector<8x32xf32> -> vector<8x32xf32>
    %c0_25 = arith.constant 0 : index
    %c0_26 = arith.constant 0 : index
    %28 = vector.load %arg11[%c0_25, %c0_26] : memref<1x32xf32, #tpu.memory_space<vmem>>, vector<1x32xf32>
    %29 = vector.broadcast %28 : vector<1x32xf32> to vector<8x32xf32>
    %30 = arith.addf %27, %29 : vector<8x32xf32>
    %cst_27 = arith.constant 0.000000e+00 : f32
    %31 = vector.broadcast %cst_27 : f32 to vector<8x32xf32>
    %32 = arith.maximumf %30, %31 : vector<8x32xf32>
    %c0_28 = arith.constant 0 : index
    %c0_29 = arith.constant 0 : index
    %33 = vector.load %arg12[%c0_28, %c0_29] : memref<1x32xf32, #tpu.memory_space<vmem>>, vector<1x32xf32>
    %34 = tpu.transpose %32, [1, 0] : vector<8x32xf32> -> vector<32x8xf32>
    %cst_30 = arith.constant dense<0.000000e+00> : vector<1x8xf32>
    %35 = tpu.matmul %33, %34, %cst_30 {dimension_numbers = #tpu.dot_dimension_numbers<[1], [0], [0], [1], [0, 0, 1, 1], [], []>} : vector<1x32xf32>, vector<32x8xf32>, vector<1x8xf32> -> vector<1x8xf32>
    %c0_31 = arith.constant 0 : index
    %c0_32 = arith.constant 0 : index
    %36 = vector.load %arg13[%c0_31, %c0_32] : memref<1x1xf32, #tpu.memory_space<vmem>>, vector<1x1xf32>
    %37 = vector.broadcast %36 : vector<1x1xf32> to vector<1x8xf32>
    %38 = arith.addf %35, %37 : vector<1x8xf32>
    %c0_33 = arith.constant 0 : index
    %c0_34 = arith.constant 0 : index
    %39 = vector.load %arg14[%c0_33, %c0_34] : memref<1x8xf32, #tpu.memory_space<vmem>>, vector<1x8xf32>
    tpu.vector_store %arg14[%c0_33, %c0_34], %38 {strides = array<i32>} : memref<1x8xf32, #tpu.memory_space<vmem>>, vector<1x8xf32>,
    return
  }
  func.func @transform_0(%arg0: i32) -> (i32, i32) {
    %c0_i32 = arith.constant 0 : i32
    %c0_i32_0 = arith.constant 0 : i32
    return %arg0, %c0_i32 : i32, i32
  }
  func.func @transform_1(%arg0: i32) -> (i32, i32) {
    %c0_i32 = arith.constant 0 : i32
    %c0_i32_0 = arith.constant 0 : i32
    return %arg0, %c0_i32 : i32, i32
  }
  func.func @transform_2(%arg0: i32) -> (i32, i32) {
    %c0_i32 = arith.constant 0 : i32
    %c0_i32_0 = arith.constant 0 : i32
    return %arg0, %c0_i32 : i32, i32
  }
  func.func @transform_3(%arg0: i32) -> (i32, i32) {
    %c0_i32 = arith.constant 0 : i32
    %c0_i32_0 = arith.constant 0 : i32
    %c0_i32_1 = arith.constant 0 : i32
    return %c0_i32, %c0_i32_0 : i32, i32
  }
  func.func @transform_4(%arg0: i32) -> (i32, i32) {
    %c0_i32 = arith.constant 0 : i32
    %c0_i32_0 = arith.constant 0 : i32
    %c0_i32_1 = arith.constant 0 : i32
    return %c0_i32, %c0_i32_0 : i32, i32
  }
  func.func @transform_5(%arg0: i32) -> (i32, i32) {
    %c0_i32 = arith.constant 0 : i32
    %c0_i32_0 = arith.constant 0 : i32
    %c0_i32_1 = arith.constant 0 : i32
    return %c0_i32, %c0_i32_0 : i32, i32
  }
  func.func @transform_6(%arg0: i32) -> (i32, i32) {
    %c0_i32 = arith.constant 0 : i32
    %c0_i32_0 = arith.constant 0 : i32
    %c0_i32_1 = arith.constant 0 : i32
    return %c0_i32, %c0_i32_0 : i32, i32
  }
  func.func @transform_7(%arg0: i32) -> (i32, i32) {
    %c0_i32 = arith.constant 0 : i32
    %c0_i32_0 = arith.constant 0 : i32
    %c0_i32_1 = arith.constant 0 : i32
    return %c0_i32, %c0_i32_0 : i32, i32
  }
  func.func @transform_8(%arg0: i32) -> (i32, i32) {
    %c0_i32 = arith.constant 0 : i32
    %c0_i32_0 = arith.constant 0 : i32
    %c0_i32_1 = arith.constant 0 : i32
    return %c0_i32, %c0_i32_0 : i32, i32
  }
  func.func @transform_9(%arg0: i32) -> (i32, i32) {
    %c0_i32 = arith.constant 0 : i32
    %c0_i32_0 = arith.constant 0 : i32
    %c0_i32_1 = arith.constant 0 : i32
    return %c0_i32, %c0_i32_0 : i32, i32
  }
  func.func @transform_10(%arg0: i32) -> (i32, i32) {
    %c0_i32 = arith.constant 0 : i32
    %c0_i32_0 = arith.constant 0 : i32
    %c0_i32_1 = arith.constant 0 : i32
    return %c0_i32, %c0_i32_0 : i32, i32
  }
  func.func @transform_11(%arg0: i32) -> (i32, i32) {
    %c0_i32 = arith.constant 0 : i32
    %c0_i32_0 = arith.constant 0 : i32
    %c0_i32_1 = arith.constant 0 : i32
    return %c0_i32, %c0_i32_0 : i32, i32
  }
  func.func @transform_12(%arg0: i32) -> (i32, i32) {
    %c0_i32 = arith.constant 0 : i32
    %c0_i32_0 = arith.constant 0 : i32
    %c0_i32_1 = arith.constant 0 : i32
    return %c0_i32, %c0_i32_0 : i32, i32
  }
  func.func @transform_13(%arg0: i32) -> (i32, i32) {
    %c0_i32 = arith.constant 0 : i32
    %c0_i32_0 = arith.constant 0 : i32
    return %c0_i32, %arg0 : i32, i32
  }
}

</mosaic_0001>

<bundles_post_ra>
// kernel: tpu_custom_call.1
= control target key start
LH: loop header
LB: loop body
LE: loop exit
PB: predicated region body
PF: predicated region fallthrough
CT: control target
= control target key end

     0   :  { %s1104_s0 = inlined_call_operand.vmem [shape: bf16[8,32], index: 0, kind: input, shape index: {}]   ;;  %s1105_s1 = inlined_call_operand.vmem [shape: bf16[8,32], index: 1, kind: input, shape index: {}]   ;;  %s1106_s2 = inlined_call_operand.vmem [shape: f32[8,300], index: 2, kind: input, shape index: {}]   ;;  %s1107_s3 = inlined_call_operand.vmem [shape: bf16[300,32], index: 3, kind: input, shape index: {}]   ;;  %s1108_s4 = inlined_call_operand.vmem [shape: f32[1,32], index: 4, kind: input, shape index: {}]   ;;  %s1109_s5 = inlined_call_operand.vmem [shape: bf16[32,64], index: 5, kind: input, shape index: {}]   ;;  %s1110_s6 = inlined_call_operand.vmem [shape: bf16[32,64], index: 6, kind: input, shape index: {}]   ;;  %s1111_s7 = inlined_call_operand.vmem [shape: bf16[32,64], index: 7, kind: input, shape index: {}]   ;;  %s1112_s8 = inlined_call_operand.vmem [shape: f32[1,64], index: 8, kind: input, shape index: {}]   ;;  %s1113_s9 = inlined_call_operand.vmem [shape: bf16[64,32], index: 9, kind: input, shape index: {}]   ;;  %s1114_s10 = inlined_call_operand.vmem [shape: f32[1,32], index: 10, kind: input, shape index: {}]   ;;  %s1115_s11 = inlined_call_operand.vmem [shape: f32[1,32], index: 11, kind: input, shape index: {}]   ;;  %s1116_s12 = inlined_call_operand.<no memory space> [shape: f32[1,1], index: 12, kind: input, shape index: {}]   ;;  %s1117_s13 = inlined_call_operand.hbm [shape: f32[1,8], index: 13, kind: output, shape index: {}]  }
   0x1   :  { %v18_v0 = vstv %s1116_s12 }
   0x2   :  { %19 = vst [vmem:[#allocation2] sm:$0x1] %v18_v0 }
   0x3   :  { %v817_v1 = vld [vmem:[%s1107_s3 + $0x40] sm:$0xff]   ;;  %v870_v3 = vmov 0.0   ;;  %v819_v4 = vld [vmem:[%s1107_s3 + $0x48] sm:$0xff]   ;;  %vm871_vm0 = vmmov 0   ;;  %v821_v6 = vld [vmem:[%s1107_s3 + $0x50] sm:$0xff]   ;;  %vm216_vm1 = vcmask 1045504  }
   0x4   :  { %v818_v2 = vld [vmem:[%s1107_s3] sm:$0xff]   ;;  %761 = vmatprep.subr.bf16.mxu1 %v870_v3  ;;  %719 = vmatprep.subr.bf16.mxu0 %v817_v1  ;;  %v820_v5 = vld [vmem:[%s1107_s3 + $0x8] sm:$0xff]   ;;  %v822_v7 = vld [vmem:[%s1107_s3 + $0x10] sm:$0xff]   ;;  %vm212_vm2 = vcmask 359424  }
   0x5   :  { %720 = vmatpush3.bf16.msra.mxu0 %v818_v2  ;;  %767 = vmatprep.mubr.msk.bf16.mxu1 %vm871_vm0, %v870_v3  ;;  %v823_v8 = vld [vmem:[%s1107_s3 + $0x58] sm:$0xff]   ;;  %v825_v10 = vld [vmem:[%s1107_s3 + $0x60] sm:$0xff]   ;;  %v832_v13 = vld [vmem:[%s1107_s3 + $0x88] sm:$0xff]  }
   0x6   :  { %721 = vmatprep.subr.bf16.mxu0 %v819_v4  ;;  %v824_v9 = vld [vmem:[%s1107_s3 + $0x18] sm:$0xff]   ;;  %v829_v11 = vld [vmem:[%s1107_s3 + $0x80] sm:$0xff]   ;;  %v827_v14 = vld [vmem:[%s1107_s3 + $0x68] sm:$0xff]  }
   0x7   :  { %v826_v12 = vld [vmem:[%s1107_s3 + $0x20] sm:$0xff]   ;;  %762 = vmatpush3.bf16.msra.mxu1 %v829_v11  ;;  %v49_v15 = vld [vmem:[%s1106_s2 + $0x8] sm:$0xff]  ;;  %v835_v18 = vld [vmem:[%s1107_s3 + $0x90] sm:$0x3f]  }
   0x8   :  { %763 = vmatprep.subr.bf16.mxu1 %v870_v3  ;;  %v828_v16 = vld [vmem:[%s1107_s3 + $0x28] sm:$0xff]   ;;  %v52_v17 = vpack.c.bf16 %v49_v15, %v49_v15  ;;  %v50_v19 = vld [vmem:[%s1106_s2 + $0x10] sm:$0xff]  ;;  %v218_v21 = vsel %vm216_vm1, %v835_v18, 0  ;;  %v836_v23 = vld [vmem:[%s1110_s6] sm:$0xff]  }
   0x9   :  { %722 = vmatpush3.bf16.msra.mxu0 %v820_v5  ;;  %v830_v20 = vld [vmem:[%s1107_s3 + $0x70] sm:$0xff]   ;;  %v53_v22 = vpack.c.bf16 %v50_v19, %v50_v19  ;;  %v833_v25 = vld [vmem:[%s1107_s3 + $0x78] sm:$0xff]   ;;  %v837_v26 = vld [vmem:[%s1110_s6 + $0x8] sm:$0xff]  }
   0xa   :  { %723 = vmatprep.subr.bf16.mxu0 %v821_v6  ;;  %252 = vmatprep.mubr.bf16.mxu0 %v52_v17  ;;  %v831_v24 = vld [vmem:[%s1107_s3 + $0x30] sm:$0xff]   ;;  %v834_v27 = vld [vmem:[%s1107_s3 + $0x38] sm:$0xff]   ;;  %v48_v28 = vld [vmem:[%s1106_s2] sm:$0xff] }
   0xb   :  { %764 = vmatpush3.bf16.msra.mxu1 %v832_v13 }
   0xc   :  { %765 = vmatprep.subr.bf16.mxu1 %v870_v3 }
   0xd   :  { %724 = vmatpush3.bf16.msra.mxu0 %v822_v7 }
   0xe   :  { %725 = vmatprep.subr.bf16.mxu0 %v823_v8 }
   0xf   :  { %766 = vmatpush3.bf16.msra.mxu1 %v218_v21 }
  0x10   :  { %771 = vmatprep.subr.bf16.mxu1 %v870_v3 }
  0x11   :  { %726 = vmatpush3.bf16.msra.mxu0 %v824_v9 }
  0x12   :  { %727 = vmatprep.subr.bf16.mxu0 %v825_v10  ;;  %768 = vmatmul.mubr.msk.bf16.vlgmr.msra.gmra.mrb[0].mxu1 %vm212_vm2, %v53_v22 }
  0x13   :  { %772 = vmatpush3.bf16.msra.mxu1 %v836_v23  ;;  %775 = vmatprep.mubr.msk.bf16.mxu1 %vm871_vm0, %v870_v3 }
  0x14   :  { %773 = vmatprep.subr.bf16.mxu1 %v870_v3 }
  0x15   :  { %728 = vmatpush3.bf16.msra.mxu0 %v826_v12 }
  0x16   :  { %729 = vmatprep.subr.bf16.mxu0 %v827_v14 }
  0x19   :  { %730 = vmatpush3.bf16.msra.mxu0 %v828_v16 }
  0x1a   :  { %731 = vmatprep.subr.bf16.mxu0 %v830_v20 }
  0x1d   :  { %732 = vmatpush3.bf16.msra.mxu0 %v831_v24 }
  0x1e   :  { %733 = vmatprep.subr.bf16.mxu0 %v833_v25 }
  0x1f   :  { %20 = vsyncpa [#allocation4], 0  ;;  %v51_v29 = vpack.c.bf16 %v48_v28, %v48_v28  ;;  %774 = vmatpush3.bf16.msra.mxu1 %v837_v26  ;;  %v306_v30 = vld [vmem:[%s1105_s1] sm:$0xf]  ;;  %vm323_vm3 = vcmask 261120   ;;  %v839_v32 = vld [vmem:[%s1109_s5 + $0x8] sm:$0xff]   ;;  %v584_v18 = vlaneseq }
  0x20   :  { %v838_v31 = vld [vmem:[%s1109_s5] sm:$0xff]   ;;  %779 = vmatprep.subr.bf16.mxu1 %v870_v3  ;;  %v841_v35 = vld [vmem:[%s1111_s7 + $0x8] sm:$0xff]   ;;  %v844_v61 = vld [vmem:[%s1113_s9 + $0x10] sm:$0xff]   ;;  %vm532_vm4 = vcmask 523264   ;;  %v872_v9 = vmov 0   ;;  %vm664_vm5 = vcmask 57344  }
  0x21   :  { %734 = vmatpush3.bf16.msra.mxu0 %v834_v27  ;;  %v301_v33 = vld [vmem:[%s1104_s0] sm:$0xf]  ;;  %v843_v37 = vld [vmem:[%s1113_s9 + $0x8] sm:$0xff]   ;;  %v845_v62 = vld [vmem:[%s1113_s9 + $0x18] sm:$0xff]   ;;  %816 = vset.pattern.permute.xlu0 %v872_v9  ;;  %v585_v19 = vshrl.u32 %v584_v18, 7 }
  0x22   :  { %795 = vmatprep.subr.bf16.mxu0 %v870_v3  ;;  %776 = vmatmul.mubr.msk.bf16.vlgmr.msra.gmra.mrb[4].mxu1 %vm323_vm3, %v306_v30  ;;  %v840_v34 = vld [vmem:[%s1111_s7] sm:$0xff]  }
  0x23   :  { %780 = vmatpush3.bf16.msra.mxu1 %v838_v31  ;;  %783 = vmatprep.mubr.msk.bf16.mxu1 %vm871_vm0, %v870_v3  ;;  %v842_v36 = vld [vmem:[%s1113_s9] sm:$0xff]   ;;  %v586_v20 = vsub.s32 0, %v585_v19 }
  0x24   :  { %253 = vmatmul.mubr.bf16.vlgmr.msra.gmra.mrb[0].mxu0 %v51_v29  ;;  %781 = vmatprep.subr.bf16.mxu1 %v870_v3  ;;  %v680_v46 = vld [vmem:[%s1108_s4] ss:$0 sm:$0xff] }
  0x25   :  { %803 = vmatprep.mubr.msk.bf16.mxu0 %vm871_vm0, %v870_v3  ;;  %796 = vmatpush3.bf16.msra.mxu0 %v842_v36  ;;  %v710_v0 = vld [vmem:[%s1112_s8] ss:$0 sm:$0xff] }
  0x26   :  { %797 = vmatprep.subr.bf16.mxu0 %v870_v3  ;;  %v711_v10 = vld [vmem:[%s1114_s10] ss:$0 sm:$0xff]  ;;  %s873_s10 = smov [#allocation3]  }
  0x27   :  { %782 = vmatpush3.bf16.msra.mxu1 %v839_v32  ;;  %v577_v17 = vld [vmem:[%s1115_s11] sm:$0x1]  ;;  %s672_s6 = sshll.u32 %s873_s10, 4  ;;  %s673_s6 = int_to_ptr.vmem [resolvable:$true] %s672_s6 }
  0x28   :  { %787 = vmatprep.subr.bf16.mxu1 %v870_v3  ;;  %s846_s21 = scalar_lea.vmem %s673_s6, 16  ;;  %s850_s3 = scalar_lea.vmem %s673_s6, 32 }
  0x29   :  { %798 = vmatpush3.bf16.msra.mxu0 %v843_v37  ;;  %p847_p0 = scmp.ne.s32.totalorder %s673_s6, %s846_s21  ;;  %p851_p1 = scmp.lt.s32.totalorder %s673_s6, %s673_s6 }
  0x2a   :  { %784 = vmatmul.mubr.msk.bf16.vlgmr.msra.gmra.mrb[8].mxu1 %vm323_vm3, %v301_v33  ;;  %799 = vmatprep.subr.bf16.mxu0 %v870_v3  ;;  %p852_p2 = scmp.lt.s32.totalorder %s850_s3, %s846_s21 }
  0x2b   :  { %791 = vmatprep.mubr.msk.bf16.mxu1 %vm871_vm0, %v870_v3  ;;  %788 = vmatpush3.bf16.msra.mxu1 %v840_v34 }
  0x2c   :  { %789 = vmatprep.subr.bf16.mxu1 %v870_v3  ;;  %p853_p3 = por %p852_p2, %p851_p1 }
  0x2d   :  { %800 = vmatpush3.bf16.msra.mxu0 %v844_v61 }
  0x2e   :  { %801 = vmatprep.subr.bf16.mxu0 %v870_v3  ;;  %p854_p4 = pnand %p853_p3, %p847_p0 }
  0x2f   :  { %790 = vmatpush3.bf16.msra.mxu1 %v841_v35 }
  0x30   :  { %807 = vmatprep.subr.mxu1 %v870_v3 }
  0x31   :  { %802 = vmatpush3.bf16.msra.mxu0 %v845_v62 }
  0xe5   :  { %v294_v38 = vpop.f32.mrb[0].mxu1 }
  0xe6   :  { %v769_v39 = vpop.f32.mrb[1].mxu1 }
  0xe7   :  { %v297_v40 = vpop.f32.mrb[2].mxu1 }
  0xe8   :  { %v770_v41 = vpop.f32.mrb[3].mxu1 }
  0xf5   :  { %v361_v42 = vpop.f32.mrb[4].mxu1 }
  0xf6   :  { %v777_v44 = vpop.f32.mrb[5].mxu1 }
  0xf7   :  { %v735_v43 = vpop.f32.mrb[0].mxu0  ;;  %v364_v47 = vpop.f32.mrb[6].mxu1 }
  0xf8   :  { %v736_v45 = vpop.f32.mrb[1].mxu0  ;;  %v778_v50 = vpop.f32.mrb[7].mxu1 }
  0xf9   :  { %v737_v48 = vadd.f32 %v736_v45, %v735_v43  ;;  %v738_v49 = vpop.f32.mrb[2].mxu0 }
  0xfa   :  { %v739_v51 = vpop.f32.mrb[3].mxu0 }
  0xfb   :  { %v255_v52 = vadd.f32 %v737_v48, %v680_v46 }
  0xfd   :  { %v295_v53 = vadd.f32 %v294_v38, %v255_v52  ;;  %v416_v54 = vpop.f32.mrb[8].mxu1 }
  0xfe   :  { %v417_v56 = vadd.f32 %v416_v54, %v361_v42  ;;  %v785_v57 = vpop.f32.mrb[9].mxu1 }
  0xff   :  { %v300_v55 = vmax.f32 %v295_v53, 0.0  ;;  %v419_v58 = vpop.f32.mrb[10].mxu1 }
 0x100   :  { %v786_v60 = vpop.f32.mrb[11].mxu1 }
 0x101   :  { %v422_v59 = vpack.c.bf16 %v300_v55, %v300_v55 }
 0x103   :  { %792 = vmatmul.mubr.msk.bf16.vlgmr.msra.gmra.mrb[12].mxu1 %vm323_vm3, %v422_v59 }
 0x104   :  { %809 = vmatprep.mubr.msk.f32.mxu1 %vm871_vm0, %v870_v3  ;;  %v578_v3 = vld [vmem:[#allocation2] sm:$0x1] }
 0x105   :  { %581 = vperm.xlu0 %816, %v578_v3  }
 0x184   :  { %v582_v21 = vpop.permute.xlu0 %581 }
 0x185   :  { %v587_v22 = vrot.slane %v582_v21, %v586_v20 }
 0x1d6   :  { %v476_v63 = vpop.f32.mrb[12].mxu1 }
 0x1d7   :  { %v482_v1 = vadd.f32 %v476_v63, %v417_v56  ;;  %v793_v2 = vpop.f32.mrb[13].mxu1 }
 0x1d8   :  { %v479_v4 = vpop.f32.mrb[14].mxu1 }
 0x1d9   :  { %v490_v5 = vadd.f32 %v710_v0, %v482_v1  ;;  %v794_v6 = vpop.f32.mrb[15].mxu1 }
 0x1db   :  { %v491_v7 = vmax.f32 %v490_v5, 0.0 }
 0x1dd   :  { %v492_v8 = vpack.c.bf16 %v491_v7, %v491_v7 }
 0x1df   :  { %804 = vmatmul.mubr.msk.bf16.vlgmr.msra.gmra.mrb[4].mxu0 %vm532_vm4, %v492_v8 }
 0x2b2   :  { %v570_v11 = vpop.f32.mrb[4].mxu0 }
 0x2b3   :  { %v571_v12 = vadd.f32 %v711_v10, %v570_v11  ;;  %v805_v13 = vpop.f32.mrb[5].mxu0 }
 0x2b4   :  { %v573_v14 = vpop.f32.mrb[6].mxu0 }
 0x2b5   :  { %v576_v15 = vmax.f32 %v571_v12, 0.0  ;;  %v806_v16 = vpop.f32.mrb[7].mxu0 }
 0x2b7   :  { %808 = vmatpush3.xpose.msk.msra.mxu1 %vm323_vm3, %v576_v15 }
 0x2ba   :  { %810 = vmatmul.mubr.msk.f32.vlgmr.msra.gmra.mrb[16].mxu1 %vm323_vm3, %v577_v17 }
 0x38d   :  { %v660_v23 = vpop.f32.mrb[16].mxu1 }
 0x38e   :  { %v661_v24 = vadd.f32 %v660_v23, %v587_v22  ;;  %v811_v25 = vpop.f32.mrb[17].mxu1 }
 0x390   :  { %665 = vst.msk [vmem:[#allocation3] sm:$0x1] %vm664_vm5, %v661_v24 }
 0x391   :  { %857 = shalt.err (!%p854_p4)
}
 0x392   :  { %s858_s2 = scalar_lea.hbm %s1117_s13, 16 }
 0x393   :  { %p859_p5 = scmp.ne.s32.totalorder %s1117_s13, %s858_s2  ;;  %p862_p6 = scmp.lt.u32.totalorder %s858_s2, %s1117_s13 }
 0x395   :  { %p864_p7 = pnand %p862_p6, %p859_p5 }
 0x397   :  { %867 = shalt.err (!%p864_p7)
}
 0x398   :  { %675 = dma.vmem_to_hbm [thread:$0]  %s673_s6, 16, %s1117_s13, [#allocation4]  }
 0x399   :  { %868 = dma.done.wait [#allocation4], 16  }
 0x39a   :  { %869 = vsyncadd [#allocation4], 4294967280 }
 0x39b   :  { %679 = vsyncpa [#allocation4], 1 }

</bundles_post_ra>
